<compile_context>
chip_gen: v7x
topology: tpu7x:2x2x1
jax: 0.10.0
libtpu: 0.0.40
codegen_flags: <defaults>
</compile_context>

<pallas_src>
import jax
import jax.numpy as jnp
from jax.experimental import pallas as pl
from jax.experimental.pallas import tpu as pltpu


def _round_up(n, m):
    return ((n + m - 1) // m) * m


def _pair_mlp_kernel(idx_ref, tt_ref, b1_ref, w2_ref, b2_ref, o_ref):
    # idx: [2, TB] int32   tt: [H, 2C]   b1: [H, 1]   w2: [H, 1]   b2: [1, 1]
    # out: [1, TB] f32
    ids = idx_ref[...]                                   # [2, TB]
    c1 = ids[0:1, :]                                     # [1, TB]
    c2 = ids[1:2, :]                                     # [1, TB]

    two_c = tt_ref.shape[1]
    num_champs = two_c // 2
    tb = ids.shape[1]

    # Single [2C, TB] one-hot: rows 0..C-1 keyed on c1, rows C..2C-1 on c2.
    iota = jax.lax.broadcasted_iota(jnp.int32, (two_c, tb), 0)     # hoisted, reused
    target = jnp.where(iota < num_champs, c1, c2 + num_champs)     # [2C, TB]
    onehot = (iota == target).astype(jnp.float32)                  # [2C, TB]

    # Fused gather + Linear(2E -> H):  h = T^T @ onehot + b1   -> [H, TB]
    h = jnp.dot(tt_ref[...], onehot, preferred_element_type=jnp.float32) + b1_ref[...]
    h = jnp.maximum(h, 0.0)

    # Linear(H -> 1): VPU multiply by [H, 1] weight column + sublane reduce.
    z = jnp.sum(h * w2_ref[...], axis=0, keepdims=True) + b2_ref[...]   # [1, TB]

    # Sigmoid via EUP tanh (stable for large |z|).
    o_ref[...] = 0.5 * jnp.tanh(0.5 * z) + 0.5


def pair_mlp_pallas(c1_idx, c2_idx, emb, w1, b1, w2, b2, *, block_rows=8192):
    """c1_idx/c2_idx: [B] int -> [B] f32 probabilities."""
    B = c1_idx.shape[0]
    C, E = emb.shape
    H = w1.shape[1]

    # Lane-dense batch tile (multiple of 128); at least 2 blocks when B is
    # large enough so v7x's two TensorCores both get work.
    tb = min(block_rows, _round_up(max(pl.cdiv(B, 2), 1), 128))
    tb = max(tb, 128)
    nb = pl.cdiv(B, tb)
    b_pad = nb * tb

    # Packed [2, B_pad] index operand (one DMA descriptor per grid step).
    idx = jnp.zeros((2, b_pad), jnp.int32)
    idx = idx.at[0, :B].set(c1_idx.astype(jnp.int32))
    idx = idx.at[1, :B].set(c2_idx.astype(jnp.int32))

    # Fuse embedding + Linear1:  T = [emb @ w1[:E]; emb @ w1[E:]]  -> [2C, H],
    # stored transposed as [H, 2C] so the kernel needs no in-kernel transpose.
    t_top = emb @ w1[:E]                              # [C, H]
    t_bot = emb @ w1[E:]                              # [C, H]
    tt = jnp.concatenate([t_top, t_bot], axis=0).T    # [H, 2C]
    tt = tt.astype(jnp.float32)

    b1_col = b1.reshape(H, 1).astype(jnp.float32)
    w2_col = w2.reshape(H, 1).astype(jnp.float32)
    b2_s = b2.reshape(1, 1).astype(jnp.float32)

    resident = lambda a: pl.BlockSpec(a.shape, lambda i: (0, 0))  # VMEM-resident

    cost = pl.CostEstimate(
        flops=int(b_pad) * (2 * 2 * C * H + 4 * H),
        transcendentals=int(b_pad),
        bytes_accessed=int(b_pad) * (8 + 4) + 4 * (H * 2 * C + 2 * H + 1),
    )

    out = pl.pallas_call(
        _pair_mlp_kernel,
        out_shape=jax.ShapeDtypeStruct((1, b_pad), jnp.float32),
        grid=(nb,),
        in_specs=[
            pl.BlockSpec((2, tb), lambda i: (0, i)),
            resident(tt),
            resident(b1_col),
            resident(w2_col),
            resident(b2_s),
        ],
        out_specs=pl.BlockSpec((1, tb), lambda i: (0, i)),
        compiler_params=pltpu.CompilerParams(dimension_semantics=("parallel",)),
        cost_estimate=cost,
    )(idx, tt, b1_col, w2_col, b2_s)

    return out[0, :B]


class PairModelPallas:
    """JAX/Pallas port of the PyTorch PairModel (forward pass)."""

    def __init__(self, num_champions, emb_dim=8, key=jax.random.PRNGKey(0)):
        k_emb, k_w1, k_b1, k_w2, k_b2 = jax.random.split(key, 5)
        hidden = 32
        in_dim = emb_dim * 2
        # Deterministic synthetic init (shapes match nn.Embedding / nn.Linear).
        self.emb = jax.random.normal(k_emb, (num_champions, emb_dim), jnp.float32)
        lim1 = 1.0 / jnp.sqrt(in_dim)
        self.w1 = jax.random.uniform(k_w1, (in_dim, hidden), jnp.float32, -lim1, lim1)
        self.b1 = jax.random.uniform(k_b1, (1, hidden), jnp.float32, -lim1, lim1)
        lim2 = 1.0 / jnp.sqrt(hidden)
        self.w2 = jax.random.uniform(k_w2, (hidden, 1), jnp.float32, -lim2, lim2)
        self.b2 = jax.random.uniform(k_b2, (1, 1), jnp.float32, -lim2, lim2)

    def __call__(self, c1_idx, c2_idx):
        return pair_mlp_pallas(
            c1_idx, c2_idx, self.emb, self.w1, self.b1, self.w2, self.b2
        )  # [B]  (matches .squeeze())


def _reference(model, c1_idx, c2_idx):
    e1 = model.emb[c1_idx]
    e2 = model.emb[c2_idx]
    x = jnp.concatenate([e1, e2], axis=1)
    h = jnp.maximum(x @ model.w1 + model.b1, 0.0)
    z = h @ model.w2 + model.b2
    return jnp.squeeze(jax.nn.sigmoid(z), axis=-1)


if __name__ == "__main__":
    key = jax.random.PRNGKey(0)
    num_champions = 16
    emb_dim = 8
    batch = 8

    model = PairModelPallas(num_champions, emb_dim=emb_dim, key=key)

    k1, k2 = jax.random.split(jax.random.PRNGKey(42))
    c1_idx = jax.random.randint(k1, (batch,), 0, num_champions, dtype=jnp.int32)
    c2_idx = jax.random.randint(k2, (batch,), 0, num_champions, dtype=jnp.int32)

    out = model(c1_idx, c2_idx)
    out = jax.block_until_ready(out)

    ref = _reference(model, c1_idx, c2_idx)
    assert out.shape == (batch,)
    assert jnp.allclose(out, ref, atol=1e-5, rtol=1e-5)
    print("KERNEL_OK")
</pallas_src>

<mosaic_0001>
module attributes {stable_mosaic.version = 11 : i64} {
  func.func @_pair_mlp_kernel(%arg0: i32, %arg1: memref<2x128xi32, #tpu.memory_space<vmem>>, %arg2: memref<32x32xf32, #tpu.memory_space<vmem>>, %arg3: memref<32x1xf32, #tpu.memory_space<vmem>>, %arg4: memref<32x1xf32, #tpu.memory_space<vmem>>, %arg5: memref<1x1xf32, #tpu.memory_space<vmem>>, %arg6: memref<1x128xf32, #tpu.memory_space<vmem>>) attributes {dimension_semantics = [#tpu.dimension_semantics<parallel>], iteration_bounds = array<i64: 1>, scalar_prefetch = 0 : i64, scratch_operands = 0 : i64, tpu.core_type = #tpu.core_type<tc>, window_params = [{transform_indices = @transform_0, window_bounds = array<i64: 2, 128>}, {pipeline_mode = #tpu.pipeline_mode<synchronous>, transform_indices = @transform_1, window_bounds = array<i64: 32, 32>}, {pipeline_mode = #tpu.pipeline_mode<synchronous>, transform_indices = @transform_2, window_bounds = array<i64: 32, 1>}, {pipeline_mode = #tpu.pipeline_mode<synchronous>, transform_indices = @transform_3, window_bounds = array<i64: 32, 1>}, {pipeline_mode = #tpu.pipeline_mode<synchronous>, transform_indices = @transform_4, window_bounds = array<i64: 1, 1>}, {transform_indices = @transform_5, window_bounds = array<i64: 1, 128>}]} {
    %c0 = arith.constant 0 : index
    %c0_0 = arith.constant 0 : index
    %0 = vector.load %arg1[%c0, %c0_0] : memref<2x128xi32, #tpu.memory_space<vmem>>, vector<2x128xi32>
    %1 = vector.extract_strided_slice %0 {offsets = [0, 0], sizes = [1, 128], strides = [1, 1]} : vector<2x128xi32> to vector<1x128xi32>
    %2 = vector.extract_strided_slice %0 {offsets = [1, 0], sizes = [1, 128], strides = [1, 1]} : vector<2x128xi32> to vector<1x128xi32>
    %3 = tpu.iota {dimensions = array<i32: 0>} : vector<32x128xi32>
    %c16_i32 = arith.constant 16 : i32
    %4 = vector.broadcast %c16_i32 : i32 to vector<32x128xi32>
    %5 = arith.cmpi slt, %3, %4 : vector<32x128xi32>
    %c16_i32_1 = arith.constant 16 : i32
    %6 = vector.broadcast %c16_i32_1 : i32 to vector<1x128xi32>
    %7 = arith.addi %2, %6 : vector<1x128xi32>
    %8 = vector.shape_cast %1 : vector<1x128xi32> to vector<1x128xi32>
    %9 = vector.broadcast %8 : vector<1x128xi32> to vector<32x128xi32>
    %10 = vector.shape_cast %7 : vector<1x128xi32> to vector<1x128xi32>
    %11 = vector.broadcast %10 : vector<1x128xi32> to vector<32x128xi32>
    %12 = arith.select %5, %9, %11 : vector<32x128xi1>, vector<32x128xi32>
    %13 = arith.cmpi eq, %3, %12 : vector<32x128xi32>
    %14 = arith.extui %13 : vector<32x128xi1> to vector<32x128xi32>
    %15 = arith.sitofp %14 : vector<32x128xi32> to vector<32x128xf32>
    %c0_2 = arith.constant 0 : index
    %c0_3 = arith.constant 0 : index
    %16 = vector.load %arg2[%c0_2, %c0_3] : memref<32x32xf32, #tpu.memory_space<vmem>>, vector<32x32xf32>
    %cst = arith.constant dense<0.000000e+00> : vector<32x128xf32>
    %17 = tpu.matmul %16, %15, %cst {dimension_numbers = #tpu.dot_dimension_numbers<[1], [0], [0], [1], [0, 0, 1, 1], [], []>} : vector<32x32xf32>, vector<32x128xf32>, vector<32x128xf32> -> vector<32x128xf32>
    %c0_4 = arith.constant 0 : index
    %c0_5 = arith.constant 0 : index
    %18 = vector.load %arg3[%c0_4, %c0_5] : memref<32x1xf32, #tpu.memory_space<vmem>>, vector<32x1xf32>
    %19 = vector.broadcast %18 : vector<32x1xf32> to vector<32x128xf32>
    %20 = arith.addf %17, %19 : vector<32x128xf32>
    %cst_6 = arith.constant 0.000000e+00 : f32
    %21 = vector.broadcast %cst_6 : f32 to vector<32x128xf32>
    %22 = arith.maximumf %20, %21 : vector<32x128xf32>
    %c0_7 = arith.constant 0 : index
    %c0_8 = arith.constant 0 : index
    %23 = vector.load %arg4[%c0_7, %c0_8] : memref<32x1xf32, #tpu.memory_space<vmem>>, vector<32x1xf32>
    %24 = vector.broadcast %23 : vector<32x1xf32> to vector<32x128xf32>
    %25 = arith.mulf %22, %24 : vector<32x128xf32>
    %cst_9 = arith.constant dense<0.000000e+00> : vector<128xf32>
    %26 = vector.multi_reduction <add>, %25, %cst_9 [0] : vector<32x128xf32> to vector<128xf32>
    %27 = vector.shape_cast %26 : vector<128xf32> to vector<1x128xf32>
    %c0_10 = arith.constant 0 : index
    %c0_11 = arith.constant 0 : index
    %28 = vector.load %arg5[%c0_10, %c0_11] : memref<1x1xf32, #tpu.memory_space<vmem>>, vector<1x1xf32>
    %29 = vector.broadcast %28 : vector<1x1xf32> to vector<1x128xf32>
    %30 = arith.addf %27, %29 : vector<1x128xf32>
    %cst_12 = arith.constant 5.000000e-01 : f32
    %31 = vector.broadcast %cst_12 : f32 to vector<1x128xf32>
    %32 = arith.mulf %31, %30 : vector<1x128xf32>
    %33 = math.tanh %32 : vector<1x128xf32>
    %cst_13 = arith.constant 5.000000e-01 : f32
    %34 = vector.broadcast %cst_13 : f32 to vector<1x128xf32>
    %35 = arith.mulf %34, %33 : vector<1x128xf32>
    %cst_14 = arith.constant 5.000000e-01 : f32
    %36 = vector.broadcast %cst_14 : f32 to vector<1x128xf32>
    %37 = arith.addf %35, %36 : vector<1x128xf32>
    %c0_15 = arith.constant 0 : index
    %c0_16 = arith.constant 0 : index
    %38 = vector.load %arg6[%c0_15, %c0_16] : memref<1x128xf32, #tpu.memory_space<vmem>>, vector<1x128xf32>
    tpu.vector_store %arg6[%c0_15, %c0_16], %37 {strides = array<i32>} : memref<1x128xf32, #tpu.memory_space<vmem>>, vector<1x128xf32>,
    return
  }
  func.func @transform_0(%arg0: i32) -> (i32, i32) {
    %c0_i32 = arith.constant 0 : i32
    %c0_i32_0 = arith.constant 0 : i32
    return %c0_i32, %arg0 : i32, i32
  }
  func.func @transform_1(%arg0: i32) -> (i32, i32) {
    %c0_i32 = arith.constant 0 : i32
    %c0_i32_0 = arith.constant 0 : i32
    %c0_i32_1 = arith.constant 0 : i32
    return %c0_i32, %c0_i32_0 : i32, i32
  }
  func.func @transform_2(%arg0: i32) -> (i32, i32) {
    %c0_i32 = arith.constant 0 : i32
    %c0_i32_0 = arith.constant 0 : i32
    %c0_i32_1 = arith.constant 0 : i32
    return %c0_i32, %c0_i32_0 : i32, i32
  }
  func.func @transform_3(%arg0: i32) -> (i32, i32) {
    %c0_i32 = arith.constant 0 : i32
    %c0_i32_0 = arith.constant 0 : i32
    %c0_i32_1 = arith.constant 0 : i32
    return %c0_i32, %c0_i32_0 : i32, i32
  }
  func.func @transform_4(%arg0: i32) -> (i32, i32) {
    %c0_i32 = arith.constant 0 : i32
    %c0_i32_0 = arith.constant 0 : i32
    %c0_i32_1 = arith.constant 0 : i32
    return %c0_i32, %c0_i32_0 : i32, i32
  }
  func.func @transform_5(%arg0: i32) -> (i32, i32) {
    %c0_i32 = arith.constant 0 : i32
    %c0_i32_0 = arith.constant 0 : i32
    return %c0_i32, %arg0 : i32, i32
  }
}

</mosaic_0001>

<bundles_post_ra>
// kernel: tpu_custom_call.1
= control target key start
LH: loop header
LB: loop body
LE: loop exit
PB: predicated region body
PF: predicated region fallthrough
CT: control target
= control target key end

     0   :  { %s435_s0 = inlined_call_operand.vmem [shape: s32[2,128], index: 0, kind: input, shape index: {}]   ;;  %s436_s1 = inlined_call_operand.vmem [shape: f32[32,32], index: 1, kind: input, shape index: {}]   ;;  %s437_s2 = inlined_call_operand.vmem [shape: f32[32,1], index: 2, kind: input, shape index: {}]   ;;  %s438_s3 = inlined_call_operand.vmem [shape: f32[32,1], index: 3, kind: input, shape index: {}]   ;;  %s439_s4 = inlined_call_operand.<no memory space> [shape: f32[1,1], index: 4, kind: input, shape index: {}]   ;;  %s440_s5 = inlined_call_operand.hbm [shape: f32[1,128], index: 5, kind: output, shape index: {}]  }
   0x1   :  { %v10_v0 = vstv %s439_s4 }
   0x2   :  { %11 = vst [vmem:[#allocation2] sm:$0x1] %v10_v0 }
   0x3   :  { %v24_v1 = vlaneseq  ;;  %v58_v2 = vld [vmem:[%s436_s1] sm:$0xff]  ;;  %vm86_vm0 = vcmask 261120   ;;  %v60_v3 = vld [vmem:[%s436_s1 + $0x10] sm:$0xff]  ;;  %v332_v6 = vmov 0   ;;  %v63_v12 = vld [vmem:[%s437_s2 + $0x8] sm:$0xff] }
   0x4   :  { %283 = vmatprep.mubr.msk.f32.mxu0 %vm86_vm0, %v58_v2  ;;  %v23_v4 = vld [vmem:[%s435_s0] sm:$0x3]  ;;  %286 = vmatprep.mubr.msk.f32.mxu1 %vm86_vm0, %v60_v3  ;;  %v64_v8 = vld [vmem:[%s437_s2 + $0x10] sm:$0xff]  ;;  %v65_v16 = vld [vmem:[%s437_s2 + $0x18] sm:$0xff] }
   0x5   :  { %v378_v5 = vshrl.u32 %v24_v1, 7  ;;  %304 = vset.pattern.permute.xlu0 %v332_v6  ;;  %v62_v7 = vld [vmem:[%s437_s2] sm:$0xff]  ;;  %v33_v9 = vadd.s32 16, %v23_v4  ;;  %305 = vset.pattern.permute.xlu1 %v332_v6 }
   0x6   :  { %68 = vperm.xlu0 %304, %v62_v7   ;;  %78 = vperm.xlu1 %305, %v64_v8  }
   0x7   :  { %v26_v10 = vadd.s32 8, %v378_v5  ;;  %v36_v11 = vsub.s32 0, %v378_v5  ;;  %v27_v13 = vadd.s32 16, %v378_v5  ;;  %v28_v14 = vadd.s32 24, %v378_v5 }
   0x8   :  { %v40_v15 = vsub.s32 1, %v378_v5 }
   0x9   :  { %12 = vsyncpa [#allocation4], 0  ;;  %v37_v17 = vrot.slane %v23_v4, %v36_v11  ;;  %v333_v19 = vmov 1.0|1.0   ;;  %v188_v20 = vld [vmem:[%s438_s3] sm:$0xff]  ;;  %v189_v21 = vld [vmem:[%s438_s3 + $0x8] sm:$0xff] }
   0xa   :  { %v41_v18 = vrot.slane %v33_v9, %v40_v15  ;;  %73 = vperm.xlu0 %304, %v63_v12   ;;  %83 = vperm.xlu1 %305, %v65_v16   ;;  %v190_v22 = vld [vmem:[%s438_s3 + $0x10] sm:$0xff]  ;;  %v191_v23 = vld [vmem:[%s438_s3 + $0x18] sm:$0xff]  ;;  %v59_v24 = vld [vmem:[%s436_s1 + $0x8] sm:$0xff] }
   0xb   :  { %vm46_vm1 = vcmp.eq.s32.totalorder %v378_v5, %v37_v17  ;;  %vm47_vm2 = vcmp.eq.s32.totalorder %v26_v10, %v37_v17  ;;  %v61_v25 = vld [vmem:[%s436_s1 + $0x18] sm:$0xff]  ;;  %v225_v26 = vld [vmem:[#allocation2] sm:$0x1]  ;;  %s334_s1 = smov [#allocation3]  }
   0xc   :  { %vm289_vm3 = vmpackc.low %vm47_vm2, %vm46_vm1  ;;  %vm48_vm4 = vcmp.eq.s32.totalorder %v27_v13, %v41_v18  ;;  %vm49_vm5 = vcmp.eq.s32.totalorder %v28_v14, %v41_v18  ;;  %s247_s3 = sshll.u32 %s334_s1, 4  ;;  %s248_s3 = int_to_ptr.vmem [resolvable:$true] %s247_s3 }
   0xd   :  { %290 = vmatprep.subr.msk.bf16.mxu0 %vm289_vm3, %v333_v19  ;;  %297 = vmatprep.subr.msk.bf16.mxu1 %vm289_vm3, %v333_v19  ;;  %vm293_vm6 = vmpackc.low %vm49_vm5, %vm48_vm4  ;;  %s308_s18 = scalar_lea.vmem %s248_s3, 16  ;;  %s312_s19 = scalar_lea.vmem %s248_s3, 32 }
   0xe   :  { %292 = vmatpush3.bf16.msk.msra.mxu0 %vm289_vm3, %v333_v19  ;;  %299 = vmatpush3.bf16.msk.msra.mxu1 %vm289_vm3, %v333_v19  ;;  %p309_p0 = scmp.ne.s32.totalorder %s248_s3, %s308_s18  ;;  %p313_p1 = scmp.lt.s32.totalorder %s248_s3, %s248_s3 }
   0xf   :  { %294 = vmatprep.subr.msk.bf16.mxu0 %vm293_vm6, %v333_v19  ;;  %298 = vmatprep.subr.msk.bf16.mxu1 %vm293_vm6, %v333_v19  ;;  %p314_p2 = scmp.lt.s32.totalorder %s312_s19, %s308_s18 }
  0x10   :  { %194 = vperm.xlu0 %304, %v188_v20   ;;  %199 = vperm.xlu1 %305, %v189_v21  }
  0x11   :  { %p315_p3 = por %p314_p2, %p313_p1 }
  0x12   :  { %296 = vmatpush3.bf16.msk.msra.mxu0 %vm293_vm6, %v333_v19  ;;  %300 = vmatpush3.bf16.msk.msra.mxu1 %vm293_vm6, %v333_v19 }
  0x13   :  { %p316_p4 = pnand %p315_p3, %p309_p0 }
  0x14   :  { %204 = vperm.xlu0 %304, %v190_v22   ;;  %209 = vperm.xlu1 %305, %v191_v23  }
  0x15   :  { %284 = vmatmul.mubr.msk.f32.vlgmr.msra.gmra.mrb[0].mxu0 %vm86_vm0, %v59_v24  ;;  %287 = vmatmul.mubr.msk.f32.vlgmr.msra.gmra.mrb[0].mxu1 %vm86_vm0, %v61_v25 }
  0x18   :  { %228 = vperm.xlu0 %304, %v225_v26  }
  0x85   :  { %v69_v27 = vpop.permute.xlu0 %68  ;;  %v79_v28 = vpop.permute.xlu1 %78 }
  0x89   :  { %v74_v29 = vpop.permute.xlu0 %73  ;;  %v84_v30 = vpop.permute.xlu1 %83 }
  0x8f   :  { %v195_v31 = vpop.permute.xlu0 %194  ;;  %v200_v40 = vpop.permute.xlu1 %199 }
  0x93   :  { %v205_v47 = vpop.permute.xlu0 %204  ;;  %v210_v50 = vpop.permute.xlu1 %209 }
  0x97   :  { %v229_v58 = vpop.permute.xlu0 %228 }
  0x98   :  { %v234_v60 = vrot.slane %v229_v58, %v36_v11 }
  0xe8   :  { %v285_v32 = vpop.f32.mrb[0].mxu0  ;;  %v288_v33 = vpop.f32.mrb[0].mxu1 }
  0xe9   :  { %v171_v34 = vadd.f32 %v285_v32, %v74_v29  ;;  %v165_v35 = vpop.f32.mrb[1].mxu0  ;;  %v175_v36 = vpop.f32.mrb[1].mxu1  ;;  %v181_v37 = vadd.f32 %v288_v33, %v84_v30 }
  0xea   :  { %v166_v38 = vadd.f32 %v165_v35, %v69_v27  ;;  %v176_v39 = vadd.f32 %v175_v36, %v79_v28 }
  0xeb   :  { %v185_v41 = vmax.f32 %v171_v34, 0.0  ;;  %v187_v45 = vmax.f32 %v181_v37, 0.0 }
  0xec   :  { %v184_v42 = vmax.f32 %v166_v38, 0.0  ;;  %v186_v43 = vmax.f32 %v176_v39, 0.0 }
  0xed   :  { %v213_v44 = vmul.f32 %v200_v40, %v185_v41  ;;  %v215_v51 = vmul.f32 %v210_v50, %v187_v45 }
  0xee   :  { %v212_v46 = vmul.f32 %v195_v31, %v184_v42  ;;  %v214_v49 = vmul.f32 %v205_v47, %v186_v43 }
  0xf0   :  { %v216_v48 = vadd.f32 %v213_v44, %v212_v46 }
  0xf2   :  { %v217_v52 = vadd.f32 %v216_v48, %v214_v49 }
  0xf4   :  { %v218_v53 = vadd.f32 %v217_v52, %v215_v51 }
  0xf6   :  { %v219_v54 = vrot.slane %v218_v53, 4 }
  0xf8   :  { %v220_v55 = vadd.f32 %v219_v54, %v218_v53 }
  0xfa   :  { %v221_v56 = vrot.slane %v220_v55, 2 }
  0xfc   :  { %v222_v57 = vadd.f32 %v221_v56, %v220_v55 }
  0xfe   :  { %v223_v59 = vrot.slane %v222_v57, 1 }
 0x100   :  { %v224_v61 = vadd.f32 %v223_v59, %v222_v57 }
 0x102   :  { %v235_v62 = vadd.f32 %v234_v60, %v224_v61 }
 0x104   :  { %v236_v63 = vmul.f32 0.5, %v235_v62 }
 0x106   :  { %306 = vtanh.f32 %v236_v63 }
 0x110   :  { %v307_v0 = vpop.eup %306 }
 0x111   :  { %v238_v1 = vmul.f32 0.5, %v307_v0 }
 0x113   :  { %v239_v2 = vadd.f32 0.5, %v238_v1 }
 0x115   :  { %240 = vst [vmem:[#allocation3] sm:$0x1] %v239_v2 }
 0x116   :  { %319 = shalt.err (!%p316_p4)
}
 0x117   :  { %s320_s22 = scalar_lea.hbm %s440_s5, 16 }
 0x118   :  { %p321_p5 = scmp.ne.s32.totalorder %s440_s5, %s320_s22  ;;  %p324_p6 = scmp.lt.u32.totalorder %s320_s22, %s440_s5 }
 0x11a   :  { %p326_p7 = pnand %p324_p6, %p321_p5 }
 0x11c   :  { %329 = shalt.err (!%p326_p7)
}
 0x11d   :  { %250 = dma.vmem_to_hbm [thread:$0]  %s248_s3, 16, %s440_s5, [#allocation4]  }
 0x11e   :  { %330 = dma.done.wait [#allocation4], 16  }
 0x11f   :  { %331 = vsyncadd [#allocation4], 4294967280 }
 0x120   :  { %254 = vsyncpa [#allocation4], 1 }

</bundles_post_ra>
